<compile_context>
chip_gen: v7x
topology: tpu7x:2x2x1
jax: 0.10.0
libtpu: 0.0.40
codegen_flags: <defaults>
</compile_context>

<pallas_src>
import functools

import jax
import jax.numpy as jnp
from jax.experimental import pallas as pl
from jax.experimental.pallas import tpu as pltpu


def _round_up(x, m):
    return ((x + m - 1) // m) * m


# ----------------------------------------------------------------------------
# Fused Pallas kernel: conv (im2col matmul) + ReLU + GAP + classifier + aux
# ----------------------------------------------------------------------------
def _fused_kernel(patches_ref, wconv_ref, clfw_ref, auxw_ref,
                  feat_ref, logit_ref, auxlogit_ref, *, inv_hw):
    """One grid step = one (TM, 9*Cin) im2col chunk of one image.

    patches_ref:  (TM, KC)        bf16 im2col rows of image b, chunk k
    wconv_ref:    (KC, F_pad)     bf16 fused conv weights (all convnets, zero pad)
    clfw_ref:     (F_pad, C_pad)  f32 classifier weight, pre-transposed + padded
    auxw_ref:     (F_pad, Ca_pad) f32 aux classifier weight (non-zero only at the
                                  last convnet's feature rows)
    feat_ref:     (8, F_pad)      f32 pooled features (resident accumulator)
    logit_ref:    (8, C_pad)      f32 logits
    auxlogit_ref: (8, Ca_pad)     f32 aux logits
    """
    b = pl.program_id(0)
    k = pl.program_id(1)
    nb = pl.num_programs(0)
    nk = pl.num_programs(1)

    @pl.when((b == 0) & (k == 0))
    def _init():
        feat_ref[...] = jnp.zeros_like(feat_ref)

    # conv as matmul (bf16 in, f32 accumulate) + ReLU, kept on the f32 result
    y = jnp.dot(patches_ref[...], wconv_ref[...],
                preferred_element_type=jnp.float32)
    y = jnp.maximum(y, 0.0)

    # global average pool: accumulate this chunk's row-sum into image b's row
    partial = jnp.sum(y, axis=0, keepdims=True)                 # (1, F_pad) f32
    feat_ref[pl.ds(b, 1), :] = feat_ref[pl.ds(b, 1), :] + partial

    @pl.when(k == nk - 1)
    def _finish_image():
        feat_ref[pl.ds(b, 1), :] = feat_ref[pl.ds(b, 1), :] * inv_hw

    # classifier + aux classifier epilogue, once, after all features are ready
    @pl.when((b == nb - 1) & (k == nk - 1))
    def _classify():
        feats = feat_ref[...]                                    # (8, F_pad) f32
        logit_ref[...] = jnp.dot(feats, clfw_ref[...],
                                 preferred_element_type=jnp.float32)
        auxlogit_ref[...] = jnp.dot(feats, auxw_ref[...],
                                    preferred_element_type=jnp.float32)


def _pick_tm(hw, max_tm=1024):
    """Largest multiple-of-8 divisor of H*W, capped so tiles stay VMEM-friendly."""
    best = 0
    for cand in range(8, min(hw, max_tm) + 1, 8):
        if hw % cand == 0:
            best = cand
    if best == 0:
        raise ValueError(f"H*W={hw} needs a multiple-of-8 divisor for row tiling")
    return best


def _fused_forward_call(patches, w_conv, clf_wt, aux_wt, n, hw, tm, inv_hw):
    kc = patches.shape[1]
    f_pad = w_conv.shape[1]
    c_pad = clf_wt.shape[1]
    ca_pad = aux_wt.shape[1]
    n_chunks = hw // tm

    kernel = functools.partial(_fused_kernel, inv_hw=inv_hw)

    return pl.pallas_call(
        kernel,
        out_shape=(
            jax.ShapeDtypeStruct((8, f_pad), jnp.float32),    # features (padded)
            jax.ShapeDtypeStruct((8, c_pad), jnp.float32),    # logits  (padded)
            jax.ShapeDtypeStruct((8, ca_pad), jnp.float32),   # aux     (padded)
        ),
        grid_spec=pltpu.PrefetchScalarGridSpec(
            num_scalar_prefetch=0,
            grid=(n, n_chunks),
            in_specs=[
                # streamed, double-buffered patch tiles: image b, chunk k
                pl.BlockSpec((tm, kc), lambda b, k: (b * n_chunks + k, 0)),
                # weights: constant block index -> DMA'd once, resident in VMEM
                pl.BlockSpec((kc, f_pad), lambda b, k: (0, 0)),
                pl.BlockSpec((f_pad, c_pad), lambda b, k: (0, 0)),
                pl.BlockSpec((f_pad, ca_pad), lambda b, k: (0, 0)),
            ],
            out_specs=[
                # lane-dense, resident output blocks (written back once)
                pl.BlockSpec((8, f_pad), lambda b, k: (0, 0)),
                pl.BlockSpec((8, c_pad), lambda b, k: (0, 0)),
                pl.BlockSpec((8, ca_pad), lambda b, k: (0, 0)),
            ],
        ),
        compiler_params=pltpu.CompilerParams(
            # Outputs are resident accumulators across BOTH grid axes -> arbitrary.
            # TODO(synk): on v7x (2 TCs) a per-image output block layout would let
            #             the batch axis be "parallel".
            dimension_semantics=("arbitrary", "arbitrary"),
            vmem_limit_bytes=32 * 1024 * 1024,   # safe on v5e/v6e/v7x (<=64 MiB)
        ),
    )(patches, w_conv, clf_wt, aux_wt)


# ----------------------------------------------------------------------------
# Glue (plain JAX): im2col, parameter construction / pre-layout
# ----------------------------------------------------------------------------
def _im2col_bf16(x_nchw):
    """NCHW -> (N*H*W, 9*Cin) bf16 im2col matrix for 3x3 / pad=1 / stride=1."""
    n, c, h, w = x_nchw.shape
    x = jnp.transpose(x_nchw, (0, 2, 3, 1)).astype(jnp.bfloat16)    # NHWC
    xp = jnp.pad(x, ((0, 0), (1, 1), (1, 1), (0, 0)))
    cols = []
    for kh in range(3):
        for kw in range(3):
            cols.append(xp[:, kh:kh + h, kw:kw + w, :])              # (N,H,W,Cin)
    patches = jnp.concatenate(cols, axis=-1)                         # (N,H,W,9C)
    return patches.reshape(n * h * w, 9 * c)


def _kaiming_linear(key, out_features, in_features):
    # nn.init.kaiming_normal_(w, nonlinearity='linear'): std = 1/sqrt(fan_in)
    std = 1.0 / jnp.sqrt(jnp.asarray(in_features, jnp.float32))
    return jax.random.normal(key, (out_features, in_features), jnp.float32) * std


def _kaiming_conv(key, cout, cin, k=3):
    std = 1.0 / jnp.sqrt(jnp.asarray(cin * k * k, jnp.float32))
    return jax.random.normal(key, (cout, cin, k, k), jnp.float32) * std


def init_basicnet_params(key, cin, nf, n_convnets, n_classes, aux_classes):
    """BasicNet.__init__/add_classes parameters, pre-fused/transposed/padded for TPU."""
    keys = jax.random.split(key, n_convnets + 2)
    out_dim = nf
    feat_dim = out_dim * n_convnets
    kc = 9 * cin
    f_pad = _round_up(feat_dim, 128)
    c_pad = _round_up(n_classes, 128)
    ca_pad = _round_up(aux_classes, 128)

    # Fused conv weight: each (Cout,Cin,3,3) -> (kh,kw,ci)->co ordering,
    # concatenated along output columns, zero-padded to 128 lanes, bf16.
    w2ds = []
    for i in range(n_convnets):
        cw = _kaiming_conv(keys[i], nf, cin)                         # (Cout,Cin,3,3)
        w2ds.append(jnp.transpose(cw, (2, 3, 1, 0)).reshape(kc, out_dim))
    w_conv = jnp.concatenate(w2ds, axis=1)                           # (KC, feat_dim)
    w_conv = jnp.pad(w_conv, ((0, 0), (0, f_pad - feat_dim))).astype(jnp.bfloat16)

    # Classifier (nn.Linear(feat_dim, n_classes, bias=False)): store pre-transposed.
    clf_w = _kaiming_linear(keys[n_convnets], n_classes, feat_dim)   # (C, F)
    clf_wt = jnp.pad(clf_w.T, ((0, f_pad - feat_dim), (0, c_pad - n_classes)))

    # Aux classifier acts on features[:, -out_dim:]; embed it at those rows of a
    # full-width matrix so the kernel epilogue needs no slicing.
    aux_w = _kaiming_linear(keys[n_convnets + 1], aux_classes, out_dim)  # (Ca, out_dim)
    aux_wt = jnp.zeros((f_pad, ca_pad), jnp.float32)
    aux_wt = aux_wt.at[feat_dim - out_dim:feat_dim, :aux_classes].set(aux_w.T)

    return {
        "w_conv": w_conv, "clf_wt": clf_wt, "aux_wt": aux_wt,
        "out_dim": out_dim, "feat_dim": feat_dim,
        "n_classes": n_classes, "aux_classes": aux_classes,
    }


@functools.partial(
    jax.jit,
    static_argnames=("feat_dim", "out_dim", "n_classes", "aux_classes"))
def basicnet_forward(x_nchw, w_conv, clf_wt, aux_wt, *,
                     feat_dim, out_dim, n_classes, aux_classes):
    """Pallas implementation of BasicNet.forward (der=True path)."""
    n, _, h, w = x_nchw.shape
    hw = h * w
    tm = _pick_tm(hw)
    patches = _im2col_bf16(x_nchw)                                   # (N*H*W, 9*Cin)

    feat_pad, logit_pad, aux_pad = _fused_forward_call(
        patches, w_conv, clf_wt, aux_wt, n, hw, tm, 1.0 / float(hw))

    # features = torch.cat([convnet(x) for convnet in self.convnets], 1)
    features = feat_pad[:n, :feat_dim]
    # logits = self.classifier(features)
    logits = logit_pad[:n, :n_classes]
    # aux_logits = self.aux_classifier(features[:, -out_dim:]) if F > out_dim
    aux_logits = aux_pad[:n, :aux_classes] if feat_dim > out_dim else None
    return {"feature": features, "logit": logits, "aux_logit": aux_logits}


# ----------------------------------------------------------------------------
# Demo
# ----------------------------------------------------------------------------
if __name__ == "__main__":
    # der=True with 2 convnets (ntask=2), nf=out_dim=16, aux_n+1 classifier,
    # n_classes = 10 total, aux_classes = 5 new + 1 = 6, use_bias=False.
    N, CIN, H, W = 2, 4, 16, 16
    NF = 16
    N_CONVNETS = 2
    N_CLASSES = 10
    AUX_CLASSES = 6

    key = jax.random.PRNGKey(0)
    kx, kp = jax.random.split(key)
    x = jax.random.normal(kx, (N, CIN, H, W), jnp.float32)           # NCHW like PyTorch

    params = init_basicnet_params(kp, CIN, NF, N_CONVNETS, N_CLASSES, AUX_CLASSES)

    out = basicnet_forward(
        x, params["w_conv"], params["clf_wt"], params["aux_wt"],
        feat_dim=params["feat_dim"], out_dim=params["out_dim"],
        n_classes=params["n_classes"], aux_classes=params["aux_classes"])

    jax.block_until_ready(out["feature"])
    jax.block_until_ready(out["logit"])
    if out["aux_logit"] is not None:
        jax.block_until_ready(out["aux_logit"])

    assert out["feature"].shape == (N, NF * N_CONVNETS)
    assert out["logit"].shape == (N, N_CLASSES)
    assert out["aux_logit"].shape == (N, AUX_CLASSES)
    print("KERNEL_OK")
</pallas_src>

<mosaic_0001>
module attributes {stable_mosaic.version = 11 : i64} {
  func.func @_fused_kernel(%arg0: i32, %arg1: i32, %arg2: memref<256x36xbf16, #tpu.memory_space<vmem>>, %arg3: memref<36x128xbf16, #tpu.memory_space<vmem>>, %arg4: memref<128x128xf32, #tpu.memory_space<vmem>>, %arg5: memref<128x128xf32, #tpu.memory_space<vmem>>, %arg6: memref<8x128xf32, #tpu.memory_space<vmem>>, %arg7: memref<8x128xf32, #tpu.memory_space<vmem>>, %arg8: memref<8x128xf32, #tpu.memory_space<vmem>>) attributes {dimension_semantics = [#tpu.dimension_semantics<arbitrary>, #tpu.dimension_semantics<arbitrary>], iteration_bounds = array<i64: 2, 1>, scalar_prefetch = 0 : i64, scratch_operands = 0 : i64, tpu.core_type = #tpu.core_type<tc>, window_params = [{transform_indices = @transform_0, window_bounds = array<i64: 256, 36>}, {pipeline_mode = #tpu.pipeline_mode<synchronous>, transform_indices = @transform_1, window_bounds = array<i64: 36, 128>}, {pipeline_mode = #tpu.pipeline_mode<synchronous>, transform_indices = @transform_2, window_bounds = array<i64: 128, 128>}, {pipeline_mode = #tpu.pipeline_mode<synchronous>, transform_indices = @transform_3, window_bounds = array<i64: 128, 128>}, {pipeline_mode = #tpu.pipeline_mode<synchronous>, transform_indices = @transform_4, window_bounds = array<i64: 8, 128>}, {pipeline_mode = #tpu.pipeline_mode<synchronous>, transform_indices = @transform_5, window_bounds = array<i64: 8, 128>}, {pipeline_mode = #tpu.pipeline_mode<synchronous>, transform_indices = @transform_6, window_bounds = array<i64: 8, 128>}]} {
    %c0_i32 = arith.constant 0 : i32
    %0 = arith.cmpi eq, %arg0, %c0_i32 : i32
    %c0_i32_0 = arith.constant 0 : i32
    %1 = arith.cmpi eq, %arg1, %c0_i32_0 : i32
    %2 = arith.andi %0, %1 : i1
    %3 = arith.extui %2 : i1 to i32
    %c0_i32_1 = arith.constant 0 : i32
    %4 = arith.cmpi ne, %3, %c0_i32_1 : i32
    scf.if %4 {
      %cst_13 = arith.constant 0.000000e+00 : f32
      %25 = vector.broadcast %cst_13 : f32 to vector<8x128xf32>
      %c0_14 = arith.constant 0 : index
      %c0_15 = arith.constant 0 : index
      %26 = vector.load %arg6[%c0_14, %c0_15] : memref<8x128xf32, #tpu.memory_space<vmem>>, vector<8x128xf32>
      tpu.vector_store %arg6[%c0_14, %c0_15], %25 {strides = array<i32>} : memref<8x128xf32, #tpu.memory_space<vmem>>, vector<8x128xf32>,
    } else {
    }
    %c0 = arith.constant 0 : index
    %c0_2 = arith.constant 0 : index
    %5 = vector.load %arg2[%c0, %c0_2] : memref<256x36xbf16, #tpu.memory_space<vmem>>, vector<256x36xbf16>
    %c0_3 = arith.constant 0 : index
    %c0_4 = arith.constant 0 : index
    %6 = vector.load %arg3[%c0_3, %c0_4] : memref<36x128xbf16, #tpu.memory_space<vmem>>, vector<36x128xbf16>
    %cst = arith.constant dense<0.000000e+00> : vector<256x128xf32>
    %7 = tpu.matmul %5, %6, %cst {dimension_numbers = #tpu.dot_dimension_numbers<[1], [0], [0], [1], [0, 0, 1, 1], [], []>} : vector<256x36xbf16>, vector<36x128xbf16>, vector<256x128xf32> -> vector<256x128xf32>
    %cst_5 = arith.constant 0.000000e+00 : f32
    %8 = vector.broadcast %cst_5 : f32 to vector<256x128xf32>
    %9 = arith.maximumf %7, %8 : vector<256x128xf32>
    %cst_6 = arith.constant dense<0.000000e+00> : vector<128xf32>
    %10 = vector.multi_reduction <add>, %9, %cst_6 [0] : vector<256x128xf32> to vector<128xf32>
    %11 = vector.shape_cast %10 : vector<128xf32> to vector<1x128xf32>
    %12 = arith.index_cast %arg0 : i32 to index
    %c0_7 = arith.constant 0 : index
    %13 = vector.load %arg6[%12, %c0_7] : memref<8x128xf32, #tpu.memory_space<vmem>>, vector<1x128xf32>
    %14 = arith.addf %13, %11 : vector<1x128xf32>
    %15 = arith.index_cast %arg0 : i32 to index
    %c0_8 = arith.constant 0 : index
    %16 = vector.load %arg6[%15, %c0_8] : memref<8x128xf32, #tpu.memory_space<vmem>>, vector<1x128xf32>
    tpu.vector_store %arg6[%15, %c0_8], %14 {strides = array<i32>} : memref<8x128xf32, #tpu.memory_space<vmem>>, vector<1x128xf32>,
    %c0_i32_9 = arith.constant 0 : i32
    %17 = arith.cmpi eq, %arg1, %c0_i32_9 : i32
    %18 = arith.extui %17 : i1 to i32
    %c0_i32_10 = arith.constant 0 : i32
    %19 = arith.cmpi ne, %18, %c0_i32_10 : i32
    scf.if %19 {
      %25 = arith.index_cast %arg0 : i32 to index
      %c0_13 = arith.constant 0 : index
      %26 = vector.load %arg6[%25, %c0_13] : memref<8x128xf32, #tpu.memory_space<vmem>>, vector<1x128xf32>
      %cst_14 = arith.constant 3.906250e-03 : f32
      %27 = vector.broadcast %cst_14 : f32 to vector<1x128xf32>
      %28 = arith.mulf %26, %27 : vector<1x128xf32>
      %29 = arith.index_cast %arg0 : i32 to index
      %c0_15 = arith.constant 0 : index
      %30 = vector.load %arg6[%29, %c0_15] : memref<8x128xf32, #tpu.memory_space<vmem>>, vector<1x128xf32>
      tpu.vector_store %arg6[%29, %c0_15], %28 {strides = array<i32>} : memref<8x128xf32, #tpu.memory_space<vmem>>, vector<1x128xf32>,
    } else {
    }
    %c1_i32 = arith.constant 1 : i32
    %20 = arith.cmpi eq, %arg0, %c1_i32 : i32
    %c0_i32_11 = arith.constant 0 : i32
    %21 = arith.cmpi eq, %arg1, %c0_i32_11 : i32
    %22 = arith.andi %20, %21 : i1
    %23 = arith.extui %22 : i1 to i32
    %c0_i32_12 = arith.constant 0 : i32
    %24 = arith.cmpi ne, %23, %c0_i32_12 : i32
    scf.if %24 {
      %c0_13 = arith.constant 0 : index
      %c0_14 = arith.constant 0 : index
      %25 = vector.load %arg6[%c0_13, %c0_14] : memref<8x128xf32, #tpu.memory_space<vmem>>, vector<8x128xf32>
      %c0_15 = arith.constant 0 : index
      %c0_16 = arith.constant 0 : index
      %26 = vector.load %arg4[%c0_15, %c0_16] : memref<128x128xf32, #tpu.memory_space<vmem>>, vector<128x128xf32>
      %cst_17 = arith.constant dense<0.000000e+00> : vector<8x128xf32>
      %27 = tpu.matmul %25, %26, %cst_17 {dimension_numbers = #tpu.dot_dimension_numbers<[1], [0], [0], [1], [0, 0, 1, 1], [], []>} : vector<8x128xf32>, vector<128x128xf32>, vector<8x128xf32> -> vector<8x128xf32>
      %c0_18 = arith.constant 0 : index
      %c0_19 = arith.constant 0 : index
      %28 = vector.load %arg7[%c0_18, %c0_19] : memref<8x128xf32, #tpu.memory_space<vmem>>, vector<8x128xf32>
      tpu.vector_store %arg7[%c0_18, %c0_19], %27 {strides = array<i32>} : memref<8x128xf32, #tpu.memory_space<vmem>>, vector<8x128xf32>,
      %c0_20 = arith.constant 0 : index
      %c0_21 = arith.constant 0 : index
      %29 = vector.load %arg5[%c0_20, %c0_21] : memref<128x128xf32, #tpu.memory_space<vmem>>, vector<128x128xf32>
      %cst_22 = arith.constant dense<0.000000e+00> : vector<8x128xf32>
      %30 = tpu.matmul %25, %29, %cst_22 {dimension_numbers = #tpu.dot_dimension_numbers<[1], [0], [0], [1], [0, 0, 1, 1], [], []>} : vector<8x128xf32>, vector<128x128xf32>, vector<8x128xf32> -> vector<8x128xf32>
      %c0_23 = arith.constant 0 : index
      %c0_24 = arith.constant 0 : index
      %31 = vector.load %arg8[%c0_23, %c0_24] : memref<8x128xf32, #tpu.memory_space<vmem>>, vector<8x128xf32>
      tpu.vector_store %arg8[%c0_23, %c0_24], %30 {strides = array<i32>} : memref<8x128xf32, #tpu.memory_space<vmem>>, vector<8x128xf32>,
    } else {
    }
    return
  }
  func.func @transform_0(%arg0: i32, %arg1: i32) -> (i32, i32) {
    %c1_i32 = arith.constant 1 : i32
    %0 = arith.muli %arg0, %c1_i32 : i32
    %1 = arith.addi %0, %arg1 : i32
    %c0_i32 = arith.constant 0 : i32
    %c0_i32_0 = arith.constant 0 : i32
    return %1, %c0_i32 : i32, i32
  }
  func.func @transform_1(%arg0: i32, %arg1: i32) -> (i32, i32) {
    %c0_i32 = arith.constant 0 : i32
    %c0_i32_0 = arith.constant 0 : i32
    %c0_i32_1 = arith.constant 0 : i32
    return %c0_i32, %c0_i32_0 : i32, i32
  }
  func.func @transform_2(%arg0: i32, %arg1: i32) -> (i32, i32) {
    %c0_i32 = arith.constant 0 : i32
    %c0_i32_0 = arith.constant 0 : i32
    %c0_i32_1 = arith.constant 0 : i32
    return %c0_i32, %c0_i32_0 : i32, i32
  }
  func.func @transform_3(%arg0: i32, %arg1: i32) -> (i32, i32) {
    %c0_i32 = arith.constant 0 : i32
    %c0_i32_0 = arith.constant 0 : i32
    %c0_i32_1 = arith.constant 0 : i32
    return %c0_i32, %c0_i32_0 : i32, i32
  }
  func.func @transform_4(%arg0: i32, %arg1: i32) -> (i32, i32) {
    %c0_i32 = arith.constant 0 : i32
    %c0_i32_0 = arith.constant 0 : i32
    %c0_i32_1 = arith.constant 0 : i32
    return %c0_i32, %c0_i32_0 : i32, i32
  }
  func.func @transform_5(%arg0: i32, %arg1: i32) -> (i32, i32) {
    %c0_i32 = arith.constant 0 : i32
    %c0_i32_0 = arith.constant 0 : i32
    %c0_i32_1 = arith.constant 0 : i32
    return %c0_i32, %c0_i32_0 : i32, i32
  }
  func.func @transform_6(%arg0: i32, %arg1: i32) -> (i32, i32) {
    %c0_i32 = arith.constant 0 : i32
    %c0_i32_0 = arith.constant 0 : i32
    %c0_i32_1 = arith.constant 0 : i32
    return %c0_i32, %c0_i32_0 : i32, i32
  }
}

</mosaic_0001>

<bundles_post_ra>
// kernel: basicnet_forward.1
= control target key start
LH: loop header
LB: loop body
LE: loop exit
PB: predicated region body
PF: predicated region fallthrough
CT: control target
= control target key end

     0   :  { %s1289_s21 = smov 0   ;;  %s1291_s22 = smov 0   ;;  %s1506_s0 = inlined_call_operand.vmem [shape: bf16[512,36], index: 0, kind: input, shape index: {}]   ;;  %s1507_s1 = inlined_call_operand.vmem [shape: bf16[36,128], index: 1, kind: input, shape index: {}]   ;;  %s1508_s2 = inlined_call_operand.vmem [shape: f32[128,128], index: 2, kind: input, shape index: {}]   ;;  %s1509_s3 = inlined_call_operand.vmem [shape: f32[128,128], index: 3, kind: input, shape index: {}]   ;;  %s1510_s4 = inlined_call_operand.vmem [shape: f32[8,128], index: 4, kind: output, shape index: {0}]   ;;  %s1511_s5 = inlined_call_operand.vmem [shape: f32[8,128], index: 5, kind: output, shape index: {1}]   ;;  %s1512_s6 = inlined_call_operand.vmem [shape: f32[8,128], index: 6, kind: output, shape index: {2}]  }
   0x1   :  { %s1293_s23 = smov 0  }
   0x2 LB: > { %s29_s24 = sadd.s32 1, %s1244_s22  ;;  %p918_p0 = scmp.ge.s32.totalorder %s1248_s23, 1  ;;  %s1248_s23 = sphi %s1293_s23, %s17_s23   ;;  %s1244_s22 = sphi %s1291_s22, %s1514_s22   ;;  %s1240_s21 = sphi %s1289_s21, %s1513_s21  }
   0x3   : > { %p31_p1 = scmp.ge.s32.totalorder %s29_s24, 2  ;;  %p219_p2 = scmp.lt.s32.totalorder %s1248_s23, 3 }
   0x5   : > { %s1516_s24 = smov (%p31_p1, %s29_s24), 0  ;;  %p220_p3 = pnand %p918_p0, %p219_p2 }
   0x6   : > { %s919_s25 = sshll.u32 (!%p220_p3), %s1240_s21, 5  ;;  %p254_p4 = scmp.eq.s32.totalorder (!%p220_p3), %s1240_s21, 0 }
   0x7   : > { %223 = sbr.rel (%p220_p3) target bundleno = 558 (0x22e), region = 36  ;;  %p247_p5 = scmp.lt.s32.totalorder (!%p220_p3), %s919_s25, 63 }
   0xe   : > { %s1518_s25 = smov (!%p247_p5, %s919_s25), 63  ;;  %259 = sbr.rel (!%p254_p4) target bundleno = 21 (0x15), region = 40 }
   0xf   : > { %s920_s26 = sshll.u32 %s1518_s25, 2  ;;  %v1250_v0 = vmov (%p254_p4), 0.0  }
  0x10   : > { %s1314_s29 = scalar_lea.vmem %s1506_s0, %s920_s26  ;;  %260 = vst [vmem:[%s1510_s4] sm:$0xff] (%p254_p4), %v1250_v0 }
  0x15 PF: > { %v1207_v1 = vld [vmem:[%s1507_s1] sm:$0xff]   ;;  %v1208_v2 = vld [vmem:[%s1507_s1 + $0x8] sm:$0xff]   ;;  %vm393_vm0 = vcmask 293888   ;;  %v1209_v3 = vld [vmem:[%s1507_s1 + $0x10] ss:$0 sps:$4 sm:$0x33]   ;;  %s676_s16 = scalar_lea.vmem %s1510_s4, %s1240_s21 }
  0x16   : > { %1015 = vmatprep.subr.bf16.mxu0 %v1207_v1  ;;  %v1210_v4 = vld [vmem:[%s1314_s29] sm:$0xff]   ;;  %1171 = vmatprep.subr.bf16.mxu1 %v1207_v1  ;;  %vm442_vm1 = vcmask 1041408   ;;  %v1211_v6 = vld [vmem:[%s1314_s29 + $0x8] sm:$0xff]   ;;  %v1212_v7 = vld [vmem:[%s1314_s29 + $0x10] sm:$0xff]   ;;  %p686_p6 = scmp.eq.s32.totalorder %s1240_s21, 1 }
  0x17   : > { %1016 = vmatpush3.bf16.msra.mxu0 %v1207_v1  ;;  %1174 = vmatpush3.bf16.msra.mxu1 %v1207_v1  ;;  %v444_v5 = vsel %vm442_vm1, %v1209_v3, 0  ;;  %v1218_v8 = vld [vmem:[%s1314_s29 + $0x40] sm:$0xff]   ;;  %v1219_v9 = vld [vmem:[%s1314_s29 + $0x48] sm:$0xff]   ;;  %v1220_v10 = vld [vmem:[%s1314_s29 + $0x50] sm:$0xff]   ;;  %vm1252_vm2 = vmmov (%p686_p6), 0  }
  0x18   : > { %1017 = vmatprep.subr.bf16.mxu0 %v1208_v2  ;;  %1021 = vmatprep.mubr.msk.bf16.mxu0 %vm393_vm0, %v1210_v4  ;;  %v1213_v11 = vld [vmem:[%s1314_s29 + $0x18] sm:$0xff]   ;;  %v1214_v13 = vld [vmem:[%s1314_s29 + $0x20] sm:$0xff]   ;;  %v1215_v15 = vld [vmem:[%s1314_s29 + $0x28] sm:$0xff]  }
  0x19   : > { %1172 = vmatprep.subr.bf16.mxu1 %v1208_v2  ;;  %1037 = vmatprep.mubr.msk.bf16.mxu1 %vm393_vm0, %v1218_v8  ;;  %v1221_v12 = vld [vmem:[%s1314_s29 + $0x58] sm:$0xff]   ;;  %v1222_v14 = vld [vmem:[%s1314_s29 + $0x60] sm:$0xff]   ;;  %v1223_v16 = vld [vmem:[%s1314_s29 + $0x68] sm:$0xff]  }
  0x1a   : > { %v1216_v17 = vld [vmem:[%s1314_s29 + $0x30] sm:$0xff]   ;;  %v1217_v19 = vld [vmem:[%s1314_s29 + $0x38] sm:$0xff]  }
  0x1b   : > { %1018 = vmatpush3.bf16.msra.mxu0 %v1208_v2  ;;  %1175 = vmatpush3.bf16.msra.mxu1 %v1208_v2  ;;  %v1224_v18 = vld [vmem:[%s1314_s29 + $0x70] sm:$0xff]   ;;  %v1225_v20 = vld [vmem:[%s1314_s29 + $0x78] sm:$0xff]  }
  0x1c   : > { %1177 = vmatprep.subr.msk.bf16.mxu0 %vm442_vm1, %v1209_v3  ;;  %1178 = vmatprep.subr.msk.bf16.mxu1 %vm442_vm1, %v1209_v3 }
  0x1f   : > { %1020 = vmatpush3.bf16.msra.mxu0 %v444_v5  ;;  %1176 = vmatpush3.bf16.msra.mxu1 %v444_v5 }
  0x22   : > { %1022 = vmatmul.mubr.msk.bf16.vlgmr.msra.gmra.mrb[0].mxu0 %vm393_vm0, %v1211_v6  ;;  %1038 = vmatmul.mubr.msk.bf16.vlgmr.msra.gmra.mrb[0].mxu1 %vm393_vm0, %v1219_v9 }
  0x23   : > { %1025 = vmatprep.mubr.msk.bf16.mxu0 %vm393_vm0, %v1212_v7  ;;  %1041 = vmatprep.mubr.msk.bf16.mxu1 %vm393_vm0, %v1220_v10 }
  0x2a   : > { %1026 = vmatmul.mubr.msk.bf16.gmra.mrb[4].mxu0 %vm393_vm0, %v1213_v11  ;;  %1042 = vmatmul.mubr.msk.bf16.gmra.mrb[4].mxu1 %vm393_vm0, %v1221_v12 }
  0x2b   : > { %1029 = vmatprep.mubr.msk.bf16.mxu0 %vm393_vm0, %v1214_v13  ;;  %1045 = vmatprep.mubr.msk.bf16.mxu1 %vm393_vm0, %v1222_v14 }
  0x32   : > { %1030 = vmatmul.mubr.msk.bf16.gmra.mrb[8].mxu0 %vm393_vm0, %v1215_v15  ;;  %1046 = vmatmul.mubr.msk.bf16.gmra.mrb[8].mxu1 %vm393_vm0, %v1223_v16 }
  0x33   : > { %1033 = vmatprep.mubr.msk.bf16.mxu0 %vm393_vm0, %v1216_v17  ;;  %1049 = vmatprep.mubr.msk.bf16.mxu1 %vm393_vm0, %v1224_v18 }
  0x3a   : > { %1034 = vmatmul.mubr.msk.bf16.gmra.mrb[12].mxu0 %vm393_vm0, %v1217_v19  ;;  %1050 = vmatmul.mubr.msk.bf16.gmra.mrb[12].mxu1 %vm393_vm0, %v1225_v20 }
  0xf5   : > { %v1023_v21 = vpop.f32.mrb[0].mxu0  ;;  %v1361_v22 = vpop.f32.mrb[0].mxu1 }
  0xf6   : > { %v480_v23 = vpop.f32.mrb[1].mxu0  ;;  %v544_v24 = vpop.f32.mrb[1].mxu1  ;;  %v609_v31 = vmax.f32 %v1023_v21, 0.0 }
  0xf7   : > { %v1024_v25 = vpop.f32.mrb[2].mxu0  ;;  %v1363_v26 = vpop.f32.mrb[2].mxu1  ;;  %v607_v29 = vmax.f32 %v480_v23, 0.0  ;;  %v623_v19 = vmax.f32 %v544_v24, 0.0 }
  0xf8   : > { %v483_v27 = vpop.f32.mrb[3].mxu0  ;;  %v547_v28 = vpop.f32.mrb[3].mxu1  ;;  %v610_v33 = vmax.f32 %v1024_v25, 0.0  ;;  %v625_v25 = vmax.f32 %v1361_v22, 0.0 }
  0xf9   : > { %v608_v30 = vmax.f32 %v483_v27, 0.0  ;;  %v624_v23 = vmax.f32 %v547_v28, 0.0 }
  0xfb   : > { %v639_v32 = vadd.f32 %v608_v30, %v607_v29  ;;  %v626_v29 = vmax.f32 %v1363_v26, 0.0 }
  0xfd   : > { %v640_v34 = vadd.f32 %v639_v32, %v609_v31  ;;  %v1027_v35 = vpop.f32.mrb[4].mxu0  ;;  %v1365_v36 = vpop.f32.mrb[4].mxu1 }
  0xfe   : > { %v496_v37 = vpop.f32.mrb[5].mxu0  ;;  %v560_v38 = vpop.f32.mrb[5].mxu1  ;;  %v613_v47 = vmax.f32 %v1027_v35, 0.0  ;;  %v629_v35 = vmax.f32 %v1365_v36, 0.0 }
  0xff   : > { %v611_v39 = vmax.f32 %v496_v37, 0.0  ;;  %v641_v40 = vadd.f32 %v640_v34, %v610_v33  ;;  %v1028_v41 = vpop.f32.mrb[6].mxu0  ;;  %v1044_v42 = vpop.f32.mrb[6].mxu1  ;;  %v627_v31 = vmax.f32 %v560_v38, 0.0 }
 0x100   : > { %v499_v43 = vpop.f32.mrb[7].mxu0  ;;  %v563_v44 = vpop.f32.mrb[7].mxu1  ;;  %v614_v49 = vmax.f32 %v1028_v41, 0.0 }
 0x101   : > { %v642_v45 = vadd.f32 %v641_v40, %v611_v39  ;;  %v612_v46 = vmax.f32 %v499_v43, 0.0  ;;  %v628_v34 = vmax.f32 %v563_v44, 0.0  ;;  %v630_v39 = vmax.f32 %v1044_v42, 0.0 }
 0x103   : > { %v643_v48 = vadd.f32 %v642_v45, %v612_v46 }
 0x105   : > { %v644_v50 = vadd.f32 %v643_v48, %v613_v47  ;;  %v1031_v51 = vpop.f32.mrb[8].mxu0  ;;  %v1047_v52 = vpop.f32.mrb[8].mxu1 }
 0x106   : > { %v512_v53 = vpop.f32.mrb[9].mxu0  ;;  %v576_v54 = vpop.f32.mrb[9].mxu1  ;;  %v617_v63 = vmax.f32 %v1031_v51, 0.0  ;;  %v633_v28 = vmax.f32 %v1047_v52, 0.0 }
 0x107   : > { %v615_v55 = vmax.f32 %v512_v53, 0.0  ;;  %v645_v56 = vadd.f32 %v644_v50, %v614_v49  ;;  %v1032_v57 = vpop.f32.mrb[10].mxu0  ;;  %v1048_v58 = vpop.f32.mrb[10].mxu1  ;;  %v631_v41 = vmax.f32 %v576_v54, 0.0 }
 0x108   : > { %v515_v59 = vpop.f32.mrb[11].mxu0  ;;  %v579_v60 = vpop.f32.mrb[11].mxu1  ;;  %v618_v1 = vmax.f32 %v1032_v57, 0.0  ;;  %v634_v22 = vmax.f32 %v1048_v58, 0.0  ;;  %v677_v57 = vld [vmem:[%s676_s16] sm:$0x1] }
 0x109   : > { %v646_v61 = vadd.f32 %v645_v56, %v615_v55  ;;  %v616_v62 = vmax.f32 %v515_v59, 0.0  ;;  %v632_v45 = vmax.f32 %v579_v60, 0.0 }
 0x10b   : > { %v647_v0 = vadd.f32 %v646_v61, %v616_v62  ;;  %v692_v62 = vld [vmem:[%s1508_s2] sm:$0xff] (%p686_p6) }
 0x10d   : > { %v648_v2 = vadd.f32 %v647_v0, %v617_v63  ;;  %v1035_v3 = vpop.f32.mrb[12].mxu0  ;;  %v1051_v4 = vpop.f32.mrb[12].mxu1  ;;  %v693_v63 = vld [vmem:[%s1508_s2 + $0x8] sm:$0xff] (%p686_p6)  ;;  %v779_v0 = vld [vmem:[%s1509_s3] sm:$0xff] (%p686_p6) }
 0x10e   : > { %v528_v5 = vpop.f32.mrb[13].mxu0  ;;  %v592_v6 = vpop.f32.mrb[13].mxu1  ;;  %v621_v15 = vmax.f32 %v1035_v3, 0.0  ;;  %v637_v50 = vmax.f32 %v1051_v4, 0.0  ;;  %v780_v3 = vld [vmem:[%s1509_s3 + $0x8] sm:$0xff] (%p686_p6)  ;;  %v694_v4 = vld [vmem:[%s1508_s2 + $0x10] sm:$0xff] (%p686_p6) }
 0x10f   : > { %v619_v7 = vmax.f32 %v528_v5, 0.0  ;;  %v649_v8 = vadd.f32 %v648_v2, %v618_v1  ;;  %v1036_v9 = vpop.f32.mrb[14].mxu0  ;;  %v1052_v10 = vpop.f32.mrb[14].mxu1  ;;  %v635_v26 = vmax.f32 %v592_v6, 0.0  ;;  %v1251_v1 = vmov (%p686_p6), 0.0|0.0   ;;  %v695_v5 = vld [vmem:[%s1508_s2 + $0x18] sm:$0xff] (%p686_p6) }
 0x110   : > { %v531_v11 = vpop.f32.mrb[15].mxu0  ;;  %v595_v12 = vpop.f32.mrb[15].mxu1  ;;  %v622_v17 = vmax.f32 %v1036_v9, 0.0  ;;  %v638_v51 = vmax.f32 %v1052_v10, 0.0  ;;  %1123 = vmatprep.subr.bf16.mxu0 (%p686_p6), %v1251_v1  ;;  %1147 = vmatprep.subr.bf16.mxu1 (%p686_p6), %v1251_v1  ;;  %v1124_v2 = vpack.c.bf16 (%p686_p6), %v693_v63, %v692_v62  ;;  %v1148_v6 = vpack.c.bf16 (%p686_p6), %v780_v3, %v779_v0 }
 0x111   : > { %v650_v13 = vadd.f32 %v649_v8, %v619_v7  ;;  %v620_v14 = vmax.f32 %v531_v11, 0.0  ;;  %v636_v49 = vmax.f32 %v595_v12, 0.0  ;;  %v781_v7 = vld [vmem:[%s1509_s3 + $0x10] sm:$0xff] (%p686_p6)  ;;  %v782_v8 = vld [vmem:[%s1509_s3 + $0x18] sm:$0xff] (%p686_p6)  ;;  %v1253_v9 = vmov (%p686_p6), 0.0   ;;  %v696_v12 = vld [vmem:[%s1508_s2 + $0x20] sm:$0xff] (%p686_p6) }
 0x112   : > { %1085 = vmatprep.mubr.msk.f32.mxu0 (%p686_p6), %vm1252_vm2, %v1253_v9  ;;  %1120 = vmatprep.mubr.msk.f32.mxu1 (%p686_p6), %vm1252_vm2, %v1253_v9  ;;  %v1127_v10 = vpack.c.bf16 (%p686_p6), %v695_v5, %v694_v4  ;;  %v1151_v11 = vpack.c.bf16 (%p686_p6), %v782_v8, %v781_v7 }
 0x113   : > { %v651_v16 = vadd.f32 %v650_v13, %v620_v14  ;;  %1125 = vmatpush3.bf16.msra.mxu0 (%p686_p6), %v1124_v2  ;;  %1149 = vmatpush3.bf16.msra.mxu1 (%p686_p6), %v1148_v6  ;;  %v697_v13 = vld [vmem:[%s1508_s2 + $0x28] sm:$0xff] (%p686_p6)  ;;  %v783_v14 = vld [vmem:[%s1509_s3 + $0x20] sm:$0xff] (%p686_p6) }
 0x114   : > { %1126 = vmatprep.subr.bf16.mxu0 (%p686_p6), %v1251_v1  ;;  %1150 = vmatprep.subr.bf16.mxu1 (%p686_p6), %v1251_v1 }
 0x115   : > { %v652_v18 = vadd.f32 %v651_v16, %v621_v15  ;;  %v784_v15 = vld [vmem:[%s1509_s3 + $0x28] sm:$0xff] (%p686_p6)  ;;  %v1130_v16 = vpack.c.bf16 (%p686_p6), %v697_v13, %v696_v12 }
 0x117   : > { %v653_v20 = vadd.f32 %v652_v18, %v622_v17  ;;  %1128 = vmatpush3.bf16.msra.mxu0 (%p686_p6), %v1127_v10  ;;  %1152 = vmatpush3.bf16.msra.mxu1 (%p686_p6), %v1151_v11  ;;  %v1154_v17 = vpack.c.bf16 (%p686_p6), %v784_v15, %v783_v14  ;;  %v698_v18 = vld [vmem:[%s1508_s2 + $0x30] sm:$0xff] (%p686_p6) }
 0x118   : > { %1129 = vmatprep.subr.bf16.mxu0 (%p686_p6), %v1251_v1  ;;  %1153 = vmatprep.subr.bf16.mxu1 (%p686_p6), %v1251_v1 }
 0x119   : > { %v654_v21 = vadd.f32 %v653_v20, %v623_v19  ;;  %v699_v19 = vld [vmem:[%s1508_s2 + $0x38] sm:$0xff] (%p686_p6)  ;;  %v785_v20 = vld [vmem:[%s1509_s3 + $0x30] sm:$0xff] (%p686_p6) }
 0x11b   : > { %v655_v27 = vadd.f32 %v654_v21, %v624_v23  ;;  %v786_v21 = vld [vmem:[%s1509_s3 + $0x38] sm:$0xff] (%p686_p6)  ;;  %1131 = vmatpush3.bf16.msra.mxu0 (%p686_p6), %v1130_v16  ;;  %v1133_v23 = vpack.c.bf16 (%p686_p6), %v699_v19, %v698_v18  ;;  %1155 = vmatpush3.bf16.msra.mxu1 (%p686_p6), %v1154_v17 }
 0x11c   : > { %1132 = vmatprep.subr.bf16.mxu0 (%p686_p6), %v1251_v1  ;;  %1156 = vmatprep.subr.bf16.mxu1 (%p686_p6), %v1251_v1 }
 0x11d   : > { %v656_v30 = vadd.f32 %v655_v27, %v625_v25  ;;  %v1157_v25 = vpack.c.bf16 (%p686_p6), %v786_v21, %v785_v20  ;;  %v700_v27 = vld [vmem:[%s1508_s2 + $0x40] sm:$0xff] (%p686_p6) }
 0x11f   : > { %v657_v32 = vadd.f32 %v656_v30, %v626_v29  ;;  %v701_v29 = vld [vmem:[%s1508_s2 + $0x48] sm:$0xff] (%p686_p6)  ;;  %v787_v30 = vld [vmem:[%s1509_s3 + $0x40] sm:$0xff] (%p686_p6)  ;;  %1134 = vmatpush3.bf16.msra.mxu0 (%p686_p6), %v1133_v23  ;;  %1158 = vmatpush3.bf16.msra.mxu1 (%p686_p6), %v1157_v25 }
 0x120   : > { %1135 = vmatprep.subr.bf16.mxu0 (%p686_p6), %v1251_v1  ;;  %1159 = vmatprep.subr.bf16.mxu1 (%p686_p6), %v1251_v1 }
 0x121   : > { %v658_v33 = vadd.f32 %v657_v32, %v627_v31  ;;  %v788_v31 = vld [vmem:[%s1509_s3 + $0x48] sm:$0xff] (%p686_p6)  ;;  %v1136_v32 = vpack.c.bf16 (%p686_p6), %v701_v29, %v700_v27 }
 0x123   : > { %v659_v37 = vadd.f32 %v658_v33, %v628_v34  ;;  %v1160_v33 = vpack.c.bf16 (%p686_p6), %v788_v31, %v787_v30  ;;  %v702_v34 = vld [vmem:[%s1508_s2 + $0x50] sm:$0xff] (%p686_p6)  ;;  %1137 = vmatpush3.bf16.msra.mxu0 (%p686_p6), %v1136_v32 }
 0x124   : > { %1138 = vmatprep.subr.bf16.mxu0 (%p686_p6), %v1251_v1 }
 0x125   : > { %v660_v40 = vadd.f32 %v659_v37, %v629_v35  ;;  %v703_v35 = vld [vmem:[%s1508_s2 + $0x58] sm:$0xff] (%p686_p6)  ;;  %v789_v37 = vld [vmem:[%s1509_s3 + $0x50] sm:$0xff] (%p686_p6)  ;;  %1161 = vmatpush3.bf16.msra.mxu1 (%p686_p6), %v1160_v33 }
 0x126   : > { %1162 = vmatprep.subr.bf16.mxu1 (%p686_p6), %v1251_v1 }
 0x127   : > { %v661_v24 = vadd.f32 %v660_v40, %v630_v39  ;;  %v790_v39 = vld [vmem:[%s1509_s3 + $0x58] sm:$0xff] (%p686_p6)  ;;  %v1139_v40 = vpack.c.bf16 (%p686_p6), %v703_v35, %v702_v34 }
 0x129   : > { %v662_v43 = vadd.f32 %v661_v24, %v631_v41  ;;  %v1163_v41 = vpack.c.bf16 (%p686_p6), %v790_v39, %v789_v37  ;;  %v704_v24 = vld [vmem:[%s1508_s2 + $0x60] sm:$0xff] (%p686_p6)  ;;  %1140 = vmatpush3.bf16.msra.mxu0 (%p686_p6), %v1139_v40 }
 0x12a   : > { %1141 = vmatprep.subr.bf16.mxu0 (%p686_p6), %v1251_v1 }
 0x12b   : > { %v663_v46 = vadd.f32 %v662_v43, %v632_v45  ;;  %v705_v43 = vld [vmem:[%s1508_s2 + $0x68] sm:$0xff] (%p686_p6)  ;;  %v791_v45 = vld [vmem:[%s1509_s3 + $0x60] sm:$0xff] (%p686_p6)  ;;  %1164 = vmatpush3.bf16.msra.mxu1 (%p686_p6), %v1163_v41 }
 0x12c   : > { %1165 = vmatprep.subr.bf16.mxu1 (%p686_p6), %v1251_v1 }
 0x12d   : > { %v664_v47 = vadd.f32 %v663_v46, %v633_v28  ;;  %v792_v28 = vld [vmem:[%s1509_s3 + $0x68] sm:$0xff] (%p686_p6)  ;;  %v1142_v46 = vpack.c.bf16 (%p686_p6), %v705_v43, %v704_v24 }
 0x12f   : > { %v665_v48 = vadd.f32 %v664_v47, %v634_v22  ;;  %v1166_v22 = vpack.c.bf16 (%p686_p6), %v792_v28, %v791_v45  ;;  %v706_v47 = vld [vmem:[%s1508_s2 + $0x70] sm:$0xff] (%p686_p6)  ;;  %1143 = vmatpush3.bf16.msra.mxu0 (%p686_p6), %v1142_v46 }
 0x130   : > { %1144 = vmatprep.subr.bf16.mxu0 (%p686_p6), %v1251_v1 }
 0x131   : > { %v666_v38 = vadd.f32 %v665_v48, %v635_v26  ;;  %v707_v26 = vld [vmem:[%s1508_s2 + $0x78] sm:$0xff] (%p686_p6)  ;;  %v793_v48 = vld [vmem:[%s1509_s3 + $0x70] sm:$0xff] (%p686_p6)  ;;  %1167 = vmatpush3.bf16.msra.mxu1 (%p686_p6), %v1166_v22 }
 0x132   : > { %1168 = vmatprep.subr.bf16.mxu1 (%p686_p6), %v1251_v1 }
 0x133   : > { %v667_v44 = vadd.f32 %v666_v38, %v636_v49  ;;  %v794_v38 = vld [vmem:[%s1509_s3 + $0x78] sm:$0xff] (%p686_p6)  ;;  %v1145_v49 = vpack.c.bf16 (%p686_p6), %v707_v26, %v706_v47 }
 0x135   : > { %v668_v36 = vadd.f32 %v667_v44, %v637_v50  ;;  %v1169_v50 = vpack.c.bf16 (%p686_p6), %v794_v38, %v793_v48  ;;  %1146 = vmatpush3.bf16.msra.mxu0 (%p686_p6), %v1145_v49 }
 0x137   : > { %v669_v53 = vadd.f32 %v668_v36, %v638_v51  ;;  %1170 = vmatpush3.bf16.msra.mxu1 (%p686_p6), %v1169_v50 }
 0x139   : > { %v670_v42 = vrot.slane %v669_v53, 4 }
 0x13b   : > { %v671_v55 = vadd.f32 %v670_v42, %v669_v53 }
 0x13d   : > { %v672_v54 = vrot.slane %v671_v55, 2 }
 0x13f   : > { %v673_v56 = vadd.f32 %v672_v54, %v671_v55 }
 0x141   : > { %v674_v52 = vrot.slane %v673_v56, 1 }
 0x143   : > { %v675_v58 = vadd.f32 %v674_v52, %v673_v56 }
 0x145   : > { %v678_v59 = vadd.f32 %v677_v57, %v675_v58 }
 0x147   : > { %679 = vst [vmem:[%s676_s16] sm:$0x1] %v678_v59 }
 0x14b   : > { %690 = sbr.rel (!%p686_p6) target bundleno = 558 (0x22e), region = 48 }
 0x14e   : > { %v683_v60 = vld [vmem:[%s676_s16] sm:$0x1] }
 0x14f   : > { %v684_v61 = vmul.f32 0.00390625, %v683_v60 }
 0x151   : > { %685 = vst [vmem:[%s676_s16] sm:$0x1] %v684_v61 }
 0x158   : > { %v691_v44 = vld [vmem:[%s1510_s4] sm:$0xff] }
 0x159   : > { %1086 = vmatmul.mubr.f32.vlgmr.msra.gmra.mrb[0].mxu0 %v691_v44  ;;  %1121 = vmatmul.mubr.f32.vlgmr.msra.gmra.mrb[0].mxu1 %v691_v44 }
 0x22c   : > { %v774_v51 = vpop.f32.mrb[0].mxu0  ;;  %v861_v36 = vpop.f32.mrb[0].mxu1 }
 0x22d   : > { %778 = vst [vmem:[%s1511_s5] sm:$0xff] %v774_v51  ;;  %v1087_v53 = vpop.f32.mrb[1].mxu0  ;;  %865 = vst [vmem:[%s1512_s6] sm:$0xff] %v861_v36  ;;  %v1122_v42 = vpop.f32.mrb[1].mxu1 }
 0x22e PF: > { %s17_s23 = sadd.s32 1, %s1248_s23   ;;  %s1513_s21 = smov %s1244_s22 }
 0x22f   : > { %p14_p7 = scmp.ge.s32.totalorder %s17_s23, 4   ;;  %s1514_s22 = smov %s1516_s24 }
 0x231   :  { %16 = sbr.rel (!%p14_p7) target bundleno = 2 (0x2), region = 91 }

</bundles_post_ra>
